<compile_context>
chip_gen: v6e
topology: v6e:2x2x1
jax: 0.10.0
libtpu: 0.0.40
codegen_flags: <defaults>
</compile_context>

<pallas_src>
import functools

import jax
import jax.numpy as jnp
from jax.experimental import pallas as pl
from jax.experimental.pallas import tpu as pltpu

K = 3  # kernel_size == stride (PyTorch MaxPool2d default), ceil_mode=False


def _maxpool_kernel(x_ref, o_ref, *, wo, m_total, mask_tail):
    """One grid step: output rows [i*tile_m, (i+1)*tile_m).

    x_ref: (3*tile_m, W)  -- 3 consecutive input rows per output row
    o_ref: (tile_m, Wo)
    """
    blk = x_ref[...]
    rows, _ = blk.shape                  # static Python ints
    tile_m = rows // K
    l = K * wo                           # input columns actually used

    if mask_tail:
        # Rows past the real input (last partial block) hold unspecified data;
        # zero them so 0 * garbage in the selection matmuls below stays 0.
        i = pl.program_id(0)
        valid = K * m_total - i * rows
        row_id = jax.lax.broadcasted_iota(jnp.int32, (rows, 1), 0)
        blk = jnp.where(row_id < valid, blk, jnp.zeros_like(blk))

    # 3-row window max (windows at every row; decimated to stride 3 below).
    rmax = jnp.maximum(jnp.maximum(blk[0:rows - 2, :], blk[1:rows - 1, :]),
                       blk[2:rows, :])                       # (rows-2, W)
    # 3-column window max.
    cmax = jnp.maximum(jnp.maximum(rmax[:, 0:l - 2], rmax[:, 1:l - 1]),
                       rmax[:, 2:l])                         # (rows-2, l-2)
    cmax = cmax.astype(jnp.float32)

    # Keep every 3rd column (w == 3*jo) via an exact one-hot matmul (MXU).
    col_sel = (jax.lax.broadcasted_iota(jnp.int32, (l - 2, wo), 0)
               == K * jax.lax.broadcasted_iota(jnp.int32, (l - 2, wo), 1)
               ).astype(jnp.float32)
    pooled_w = jnp.dot(cmax, col_sel,
                       preferred_element_type=jnp.float32)   # (rows-2, wo)

    # Keep every 3rd row (q == 3*r) likewise.
    row_sel = (jax.lax.broadcasted_iota(jnp.int32, (tile_m, rows - 2), 1)
               == K * jax.lax.broadcasted_iota(jnp.int32, (tile_m, rows - 2), 0)
               ).astype(jnp.float32)
    out = jnp.dot(row_sel, pooled_w,
                  preferred_element_type=jnp.float32)        # (tile_m, wo)

    o_ref[...] = out.astype(o_ref.dtype)


def _vmem_capacity_bytes():
    try:
        info = pltpu.get_tpu_info()
        cap = getattr(info, "vmem_capacity_bytes", None)
        if cap:
            return int(cap)
    except Exception:
        pass
    return 64 * 1024 * 1024  # conservative default (v7x per-core VMEM)


def _round_up(x, m):
    return -(-x // m) * m


def _block_vmem_bytes(tile_m, w_in, wo, itemsize):
    """Rough VMEM bytes for one grid step (pipeline buffers + big temporaries)."""
    lanes_in = _round_up(max(w_in, 1), 128)
    lanes_out = _round_up(max(wo, 1), 128)
    rows = K * tile_m
    in_buf = rows * lanes_in * itemsize
    out_buf = _round_up(tile_m, 8) * lanes_out * itemsize
    temps = 3 * rows * lanes_in * 4                 # blk / rmax / cmax (f32)
    sel = 4 * (K * wo * wo + K * tile_m * tile_m)   # one-hot selection matrices
    return 2 * (in_buf + out_buf) + temps + sel     # x2: double-buffered pipeline


def _choose_tile_m(m_rows, w_in, wo, itemsize, budget):
    # Cap at 512 so the row-selection matmul stays far below the DMA roofline.
    cap = min(max(8, _round_up(m_rows, 8)), 512)
    tile = 8
    while tile < cap:
        nxt = min(tile * 2, cap)
        if _block_vmem_bytes(nxt, w_in, wo, itemsize) > budget:
            break
        tile = nxt
    return tile


def tudui_forward(x):
    """MaxPool2d(kernel_size=3, stride=3, padding=0, ceil_mode=False) on NCHW."""
    n, c, h, w = x.shape
    ho, wo = h // K, w // K
    if ho == 0 or wo == 0:
        raise ValueError("MaxPool2d(kernel_size=3) needs H >= 3 and W >= 3")

    m_rows = n * c * ho                     # flattened (N, C, Ho) output rows
    itemsize = jnp.dtype(x.dtype).itemsize

    capacity = _vmem_capacity_bytes()
    budget = min(capacity // 4, 32 * 1024 * 1024)
    vmem_limit = int(min(capacity // 2, 64 * 1024 * 1024))

    tile_m = _choose_tile_m(m_rows, w, wo, itemsize, budget)
    grid_m = -(-m_rows // tile_m)
    mask_tail = (m_rows % tile_m) != 0

    # Wrapper-side layout work is reshape-only (free when H % 3 == 0); the
    # kernel reads the input from HBM exactly once.
    x2 = x.reshape(n * c, h, w)
    if h != K * ho:                         # rare: drop the unused bottom rows
        x2 = x2[:, :K * ho, :]
    x2 = x2.reshape(m_rows * K, w)          # extra W%3 columns stay, never read

    kernel = functools.partial(_maxpool_kernel, wo=wo, m_total=m_rows,
                               mask_tail=mask_tail)
    out = pl.pallas_call(
        kernel,
        out_shape=jax.ShapeDtypeStruct((m_rows, wo), x.dtype),
        grid=(grid_m,),
        in_specs=[pl.BlockSpec((K * tile_m, w), lambda i: (i, 0))],
        out_specs=pl.BlockSpec((tile_m, wo), lambda i: (i, 0)),
        compiler_params=pltpu.CompilerParams(
            dimension_semantics=("parallel",),
            vmem_limit_bytes=vmem_limit),
    )(x2)

    return out.reshape(n, c, ho, wo)


if __name__ == "__main__":
    key = jax.random.PRNGKey(0)
    x = jax.random.normal(key, (2, 4, 16, 16), dtype=jnp.float32)

    y = jax.block_until_ready(jax.jit(tudui_forward)(x))

    # Pure-JAX reference (same semantics as nn.MaxPool2d(3, ceil_mode=False)).
    ref = jax.lax.reduce_window(
        x, -jnp.inf, jax.lax.max,
        window_dimensions=(1, 1, K, K),
        window_strides=(1, 1, K, K),
        padding="VALID",
    )
    assert y.shape == ref.shape == (2, 4, 5, 5), (y.shape, ref.shape)
    assert jnp.allclose(y, ref), "Pallas max-pool mismatch vs reference"

    print("KERNEL_OK")
</pallas_src>

<mosaic_0001>
module attributes {stable_mosaic.version = 11 : i64} {
  func.func @_maxpool_kernel(%arg0: i32, %arg1: memref<120x16xf32, #tpu.memory_space<vmem>>, %arg2: memref<40x5xf32, #tpu.memory_space<vmem>>) attributes {dimension_semantics = [#tpu.dimension_semantics<parallel>], iteration_bounds = array<i64: 1>, scalar_prefetch = 0 : i64, scratch_operands = 0 : i64, tpu.core_type = #tpu.core_type<tc>, window_params = [{transform_indices = @transform_0, window_bounds = array<i64: 120, 16>}, {transform_indices = @transform_1, window_bounds = array<i64: 40, 5>}]} {
    %c0 = arith.constant 0 : index
    %c0_0 = arith.constant 0 : index
    %0 = vector.load %arg1[%c0, %c0_0] : memref<120x16xf32, #tpu.memory_space<vmem>>, vector<120x16xf32>
    %1 = vector.extract_strided_slice %0 {offsets = [0, 0], sizes = [118, 16], strides = [1, 1]} : vector<120x16xf32> to vector<118x16xf32>
    %2 = vector.extract_strided_slice %0 {offsets = [1, 0], sizes = [118, 16], strides = [1, 1]} : vector<120x16xf32> to vector<118x16xf32>
    %3 = arith.maximumf %1, %2 : vector<118x16xf32>
    %4 = vector.extract_strided_slice %0 {offsets = [2, 0], sizes = [118, 16], strides = [1, 1]} : vector<120x16xf32> to vector<118x16xf32>
    %5 = arith.maximumf %3, %4 : vector<118x16xf32>
    %6 = vector.extract_strided_slice %5 {offsets = [0, 0], sizes = [118, 13], strides = [1, 1]} : vector<118x16xf32> to vector<118x13xf32>
    %7 = vector.extract_strided_slice %5 {offsets = [0, 1], sizes = [118, 13], strides = [1, 1]} : vector<118x16xf32> to vector<118x13xf32>
    %8 = arith.maximumf %6, %7 : vector<118x13xf32>
    %9 = vector.extract_strided_slice %5 {offsets = [0, 2], sizes = [118, 13], strides = [1, 1]} : vector<118x16xf32> to vector<118x13xf32>
    %10 = arith.maximumf %8, %9 : vector<118x13xf32>
    %11 = tpu.iota {dimensions = array<i32: 0>} : vector<13x5xi32>
    %12 = tpu.iota {dimensions = array<i32: 1>} : vector<13x5xi32>
    %c3_i32 = arith.constant 3 : i32
    %13 = vector.broadcast %c3_i32 : i32 to vector<13x5xi32>
    %14 = arith.muli %13, %12 : vector<13x5xi32>
    %15 = arith.cmpi eq, %11, %14 : vector<13x5xi32>
    %16 = arith.extui %15 : vector<13x5xi1> to vector<13x5xi32>
    %17 = arith.sitofp %16 : vector<13x5xi32> to vector<13x5xf32>
    %cst = arith.constant dense<0.000000e+00> : vector<118x5xf32>
    %18 = tpu.matmul %10, %17, %cst {dimension_numbers = #tpu.dot_dimension_numbers<[1], [0], [0], [1], [0, 0, 1, 1], [], []>} : vector<118x13xf32>, vector<13x5xf32>, vector<118x5xf32> -> vector<118x5xf32>
    %19 = tpu.iota {dimensions = array<i32: 1>} : vector<40x118xi32>
    %20 = tpu.iota {dimensions = array<i32: 0>} : vector<40x118xi32>
    %c3_i32_1 = arith.constant 3 : i32
    %21 = vector.broadcast %c3_i32_1 : i32 to vector<40x118xi32>
    %22 = arith.muli %21, %20 : vector<40x118xi32>
    %23 = arith.cmpi eq, %19, %22 : vector<40x118xi32>
    %24 = arith.extui %23 : vector<40x118xi1> to vector<40x118xi32>
    %25 = arith.sitofp %24 : vector<40x118xi32> to vector<40x118xf32>
    %cst_2 = arith.constant dense<0.000000e+00> : vector<40x5xf32>
    %26 = tpu.matmul %25, %18, %cst_2 {dimension_numbers = #tpu.dot_dimension_numbers<[1], [0], [0], [1], [0, 0, 1, 1], [], []>} : vector<40x118xf32>, vector<118x5xf32>, vector<40x5xf32> -> vector<40x5xf32>
    %c0_3 = arith.constant 0 : index
    %c0_4 = arith.constant 0 : index
    %27 = vector.load %arg2[%c0_3, %c0_4] : memref<40x5xf32, #tpu.memory_space<vmem>>, vector<40x5xf32>
    tpu.vector_store %arg2[%c0_3, %c0_4], %26 {strides = array<i32>} : memref<40x5xf32, #tpu.memory_space<vmem>>, vector<40x5xf32>,
    return
  }
  func.func @transform_0(%arg0: i32) -> (i32, i32) {
    %c0_i32 = arith.constant 0 : i32
    %c0_i32_0 = arith.constant 0 : i32
    return %arg0, %c0_i32 : i32, i32
  }
  func.func @transform_1(%arg0: i32) -> (i32, i32) {
    %c0_i32 = arith.constant 0 : i32
    %c0_i32_0 = arith.constant 0 : i32
    return %arg0, %c0_i32 : i32, i32
  }
}

</mosaic_0001>

<bundles_post_ra>
// kernel: tudui_forward.1
= control target key start
LH: loop header
LB: loop body
LE: loop exit
PB: predicated region body
PF: predicated region fallthrough
CT: control target
= control target key end

     0   :  { %vm38_vm0 = vcmask 1046528   ;;  %vm98_vm1 = vcmask 1045504   ;;  %v803_v3 = vmov 0.0   ;;  %vm804_vm2 = vmmov 0   ;;  %s805_s18 = smov 127   ;;  %s806_s21 = smov 126   ;;  %s1118_s0 = inlined_call_operand.vmem [shape: f32[120,16], index: 0, kind: input, shape index: {}]   ;;  %s1119_s1 = inlined_call_operand.vmem [shape: f32[40,5], index: 1, kind: output, shape index: {}]  }
   0x1   :  { %v8_v0 = vld [vmem:[%s1118_s0] sm:$0xff]  ;;  %v9_v1 = vld [vmem:[%s1118_s0 + $0x8] sm:$0xff]  ;;  %v10_v2 = vld [vmem:[%s1118_s0 + $0x10] sm:$0xff]  ;;  %704 = vmatprep.subr.mxu0 %v803_v3  ;;  %753 = vmatprep.subr.mxu1 %v803_v3  ;;  %v293_v40 = vlaneseq  ;;  %vm351_vm3 = vcmask 1044480   ;;  %vm305_vm6 = vcmask 105472   ;;  %vm518_vm8 = vcmask 965632  }
   0x2   :  { %v39_v4 = vrot.slane %v8_v0, 1  ;;  %v40_v5 = vrot.slane %v9_v1, 1  ;;  %v99_v6 = vrot.slane %v8_v0, 2  ;;  %v100_v7 = vrot.slane %v9_v1, 2  ;;  %v11_v8 = vld [vmem:[%s1118_s0 + $0x18] sm:$0xff]  ;;  %708 = vmatprep.mubr.msk.f32.mxu0 %vm804_vm2, %v803_v3  ;;  %783 = vmatprep.mubr.msk.f32.mxu1 %vm804_vm2, %v803_v3  ;;  %v12_v12 = vld [vmem:[%s1118_s0 + $0x20] sm:$0xff] }
   0x3   :  { %v42_v9 = vrot.slane %v10_v2, 1  ;;  %v102_v10 = vrot.slane %v10_v2, 2  ;;  %v44_v11 = vrot.slane %v11_v8, 1  ;;  %v104_v20 = vrot.slane %v11_v8, 2  ;;  %v13_v23 = vld [vmem:[%s1118_s0 + $0x28] sm:$0xff]  ;;  %v14_v30 = vld [vmem:[%s1118_s0 + $0x30] sm:$0xff] }
   0x4   :  { %v41_v13 = vsel %vm38_vm0, %v39_v4, %v40_v5  ;;  %v101_v14 = vsel %vm98_vm1, %v99_v6, %v100_v7  ;;  %v46_v21 = vrot.slane %v12_v12, 1  ;;  %v106_v28 = vrot.slane %v12_v12, 2  ;;  %v15_v37 = vld [vmem:[%s1118_s0 + $0x38] sm:$0xff]  ;;  %v16_v45 = vld [vmem:[%s1118_s0 + $0x40] sm:$0xff]  ;;  %v17_v53 = vld [vmem:[%s1118_s0 + $0x48] sm:$0xff] }
   0x5   :  { %v83_v15 = vmax.f32 %v8_v0, %v41_v13  ;;  %v43_v16 = vsel %vm38_vm0, %v40_v5, %v42_v9  ;;  %v103_v17 = vsel %vm98_vm1, %v100_v7, %v102_v10  ;;  %v45_v19 = vsel %vm38_vm0, %v42_v9, %v44_v11  ;;  %v18_v63 = vld [vmem:[%s1118_s0 + $0x50] sm:$0xff] }
   0x6   :  { %v84_v18 = vmax.f32 %v9_v1, %v43_v16  ;;  %v85_v25 = vmax.f32 %v10_v2, %v45_v19  ;;  %v105_v26 = vsel %vm98_vm1, %v102_v10, %v104_v20  ;;  %v47_v27 = vsel %vm38_vm0, %v44_v11, %v46_v21  ;;  %v20_v16 = vld [vmem:[%s1118_s0 + $0x60] sm:$0xff] }
   0x7   :  { %v844_v22 = vmax.f32 %v83_v15, %v101_v14  ;;  %v48_v29 = vrot.slane %v13_v23, 1  ;;  %v86_v32 = vmax.f32 %v11_v8, %v47_v27  ;;  %v107_v33 = vsel %vm98_vm1, %v104_v20, %v106_v28  ;;  %v19_v8 = vld [vmem:[%s1118_s0 + $0x58] sm:$0xff] }
   0x8   :  { %v849_v24 = vmax.f32 %v84_v18, %v103_v17  ;;  %v862_v31 = vmax.f32 %v85_v25, %v105_v26  ;;  %v108_v35 = vrot.slane %v13_v23, 2  ;;  %v50_v36 = vrot.slane %v14_v30, 1  ;;  %v21_v25 = vld [vmem:[%s1118_s0 + $0x68] sm:$0xff] }
   0x9   :  { %173 = vrot.lane.b32.xlu0 %v844_v22, %s805_s18  ;;  %v49_v34 = vsel %vm38_vm0, %v46_v21, %v48_v29  ;;  %v873_v38 = vmax.f32 %v86_v32, %v107_v33  ;;  %v110_v43 = vrot.slane %v14_v30, 2  ;;  %v52_v44 = vrot.slane %v15_v37, 1  ;;  %v22_v33 = vld [vmem:[%s1118_s0 + $0x70] sm:$0xff] }
   0xa   :  { %175 = vrot.lane.b32.xlu1 %v849_v24, %s805_s18  ;;  %v87_v39 = vmax.f32 %v12_v12, %v49_v34  ;;  %v109_v41 = vsel %vm98_vm1, %v106_v28, %v108_v35  ;;  %v51_v42 = vsel %vm38_vm0, %v48_v29, %v50_v36  ;;  %v886_v48 = vshrl.u32 %v293_v40, 7 }
   0xb   :  { %v88_v47 = vmax.f32 %v13_v23, %v51_v42  ;;  %v111_v49 = vsel %vm98_vm1, %v108_v35, %v110_v43  ;;  %v53_v50 = vsel %vm38_vm0, %v50_v36, %v52_v44  ;;  %v112_v51 = vrot.slane %v15_v37, 2 }
   0xc   :  { %v884_v46 = vmax.f32 %v87_v39, %v109_v41  ;;  %v54_v52 = vrot.slane %v16_v45, 1  ;;  %v896_v54 = vadd.s32 8, %v886_v48  ;;  %v898_v55 = vand.u32 127, %v293_v40 }
   0xd   :  { %233 = vrot.lane.b32.xlu0 %v844_v22, %s806_s21  ;;  %v902_v56 = vmax.f32 %v88_v47, %v111_v49  ;;  %v89_v57 = vmax.f32 %v14_v30, %v53_v50  ;;  %v113_v59 = vsel %vm98_vm1, %v110_v43, %v112_v51  ;;  %v114_v61 = vrot.slane %v16_v45, 2 }
   0xe   :  { %235 = vrot.lane.b32.xlu1 %v849_v24, %s806_s21  ;;  %v298_v58 = vmul.u32 3, %v898_v55  ;;  %v55_v60 = vsel %vm38_vm0, %v52_v44, %v54_v52  ;;  %v56_v62 = vrot.slane %v17_v53, 1  ;;  %v116_v6 = vrot.slane %v17_v53, 2 }
   0xf   :  { %v917_v1 = vmax.f32 %v89_v57, %v113_v59  ;;  %v90_v2 = vmax.f32 %v15_v37, %v55_v60  ;;  %v115_v4 = vsel %vm98_vm1, %v112_v51, %v114_v61  ;;  %v58_v7 = vrot.slane %v18_v63, 1 }
  0x10   :  { %vm300_vm4 = vcmp.eq.s32.totalorder %v896_v54, %v298_v58  ;;  %vm299_vm5 = vcmp.eq.s32.totalorder %v886_v48, %v298_v58  ;;  %v57_v5 = vsel %vm38_vm0, %v54_v52, %v56_v62  ;;  %v807_v9 = vmov 1.0  }
  0x11   :  { %177 = vrot.lane.b32.xlu0 %v862_v31, %s805_s18  ;;  %v638_v0 = vsel %vm300_vm4, 1.0, %v803_v3  ;;  %v929_v10 = vmax.f32 %v90_v2, %v115_v4  ;;  %v91_v11 = vmax.f32 %v16_v45, %v57_v5  ;;  %v117_v12 = vsel %vm98_vm1, %v114_v61, %v116_v6 }
  0x12   :  { %237 = vrot.lane.b32.xlu1 %v862_v31, %s806_s21  ;;  %705 = vmatpush3.msk.msra.mxu0 %vm351_vm3, %v638_v0  ;;  %v59_v13 = vsel %vm38_vm0, %v56_v62, %v58_v7  ;;  %v118_v14 = vrot.slane %v18_v63, 2  ;;  %v60_v15 = vrot.slane %v19_v8, 1  ;;  %v120_v21 = vrot.slane %v19_v8, 2 }
  0x13   :  { %706 = vmatprep.subr.mxu0 %v803_v3  ;;  %v940_v17 = vmax.f32 %v91_v11, %v117_v12  ;;  %v92_v18 = vmax.f32 %v17_v53, %v59_v13  ;;  %v62_v23 = vrot.slane %v20_v16, 1  ;;  %v122_v30 = vrot.slane %v20_v16, 2 }
  0x14   :  { %707 = vmatpush3.msk.msra.mxu0 %vm299_vm5, %v807_v9  ;;  %v119_v19 = vsel %vm98_vm1, %v116_v6, %v118_v14  ;;  %v61_v20 = vsel %vm38_vm0, %v58_v7, %v60_v15  ;;  %v121_v28 = vsel %vm98_vm1, %v118_v14, %v120_v21  ;;  %v64_v32 = vrot.slane %v21_v25, 1 }
  0x15   :  { %179 = vrot.lane.b32.xlu0 %v873_v38, %s805_s18  ;;  %v951_v26 = vmax.f32 %v92_v18, %v119_v19  ;;  %v93_v27 = vmax.f32 %v18_v63, %v61_v20  ;;  %v63_v29 = vsel %vm38_vm0, %v60_v15, %v62_v23  ;;  %v123_v36 = vsel %vm98_vm1, %v120_v21, %v122_v30 }
  0x16   :  { %239 = vrot.lane.b32.xlu1 %v873_v38, %s806_s21  ;;  %v94_v35 = vmax.f32 %v19_v8, %v63_v29  ;;  %v65_v37 = vsel %vm38_vm0, %v62_v23, %v64_v32  ;;  %v124_v39 = vrot.slane %v21_v25, 2  ;;  %v66_v40 = vrot.slane %v22_v33, 1 }
  0x17   :  { %v962_v34 = vmax.f32 %v93_v27, %v121_v28  ;;  %v95_v42 = vmax.f32 %v20_v16, %v65_v37  ;;  %v126_v45 = vrot.slane %v22_v33, 2  ;;  %vm627_vm13 = vcmask 39936  }
  0x18   :  { %v970_v41 = vmax.f32 %v94_v35, %v123_v36  ;;  %v125_v43 = vsel %vm98_vm1, %v122_v30, %v124_v39  ;;  %v67_v44 = vsel %vm38_vm0, %v64_v32, %v66_v40  ;;  %v97_v52 = vmax.f32 %v22_v33, %v66_v40 }
  0x19   :  { %181 = vrot.lane.b32.xlu0 %v884_v46, %s805_s18  ;;  %v978_v47 = vmax.f32 %v95_v42, %v125_v43  ;;  %v96_v49 = vmax.f32 %v21_v25, %v67_v44  ;;  %v127_v50 = vsel %vm98_vm1, %v124_v39, %v126_v45 }
  0x1a   :  { %241 = vrot.lane.b32.xlu1 %v884_v46, %s806_s21  ;;  %v991_v53 = vmax.f32 %v97_v52, %v126_v45 }
  0x1b   :  { %v985_v51 = vmax.f32 %v96_v49, %v127_v50 }
  0x1d   :  { %183 = vrot.lane.b32.xlu0 %v902_v56, %s805_s18 }
  0x1e   :  { %243 = vrot.lane.b32.xlu1 %v902_v56, %s806_s21 }
  0x21   :  { %185 = vrot.lane.b32.xlu0 %v917_v1, %s805_s18 }
  0x22   :  { %245 = vrot.lane.b32.xlu1 %v917_v1, %s806_s21 }
  0x25   :  { %187 = vrot.lane.b32.xlu0 %v929_v10, %s805_s18 }
  0x26   :  { %247 = vrot.lane.b32.xlu1 %v929_v10, %s806_s21 }
  0x29   :  { %189 = vrot.lane.b32.xlu0 %v940_v17, %s805_s18 }
  0x2a   :  { %249 = vrot.lane.b32.xlu1 %v940_v17, %s806_s21 }
  0x2d   :  { %191 = vrot.lane.b32.xlu0 %v951_v26, %s805_s18 }
  0x2e   :  { %251 = vrot.lane.b32.xlu1 %v951_v26, %s806_s21 }
  0x31   :  { %193 = vrot.lane.b32.xlu0 %v962_v34, %s805_s18 }
  0x32   :  { %253 = vrot.lane.b32.xlu1 %v962_v34, %s806_s21 }
  0x35   :  { %195 = vrot.lane.b32.xlu0 %v970_v41, %s805_s18 }
  0x36   :  { %255 = vrot.lane.b32.xlu1 %v970_v41, %s806_s21 }
  0x39   :  { %197 = vrot.lane.b32.xlu0 %v978_v47, %s805_s18 }
  0x3a   :  { %257 = vrot.lane.b32.xlu1 %v978_v47, %s806_s21 }
  0x3d   :  { %199 = vrot.lane.b32.xlu0 %v985_v51, %s805_s18 }
  0x3e   :  { %259 = vrot.lane.b32.xlu1 %v985_v51, %s806_s21 }
  0x41   :  { %201 = vrot.lane.b32.xlu0 %v991_v53, %s805_s18 }
  0x42   :  { %261 = vrot.lane.b32.xlu1 %v991_v53, %s806_s21 }
  0x7b   :  { %v174_v57 = vpop.permute.xlu0 %173 }
  0x7c   :  { %v176_v58 = vpop.permute.xlu1 %175  ;;  %v218_v59 = vmax.f32 %v844_v22, %v174_v57 }
  0x7d   :  { %v219_v61 = vmax.f32 %v849_v24, %v176_v58 }
  0x7f   :  { %v234_v60 = vpop.permute.xlu0 %233 }
  0x80   :  { %v278_v62 = vmax.f32 %v218_v59, %v234_v60  ;;  %v236_v63 = vpop.permute.xlu1 %235 }
  0x81   :  { %v279_v2 = vmax.f32 %v219_v61, %v236_v63 }
  0x82   :  { %709 = vmatmul.mubr.msk.f32.vlgmr.msra.gmra.mxu0 %vm305_vm6, %v278_v62 }
  0x83   :  { %711 = vmatprep.mubr.msk.f32.mxu0 %vm804_vm2, %v803_v3  ;;  %v178_v0 = vpop.permute.xlu0 %177 }
  0x84   :  { %v220_v4 = vmax.f32 %v862_v31, %v178_v0  ;;  %v238_v5 = vpop.permute.xlu1 %237 }
  0x86   :  { %712 = vmatmul.mubr.msk.f32.gmra.mxu0 %vm305_vm6, %v279_v2  ;;  %v280_v6 = vmax.f32 %v220_v4, %v238_v5 }
  0x87   :  { %714 = vmatprep.mubr.msk.f32.mxu0 %vm804_vm2, %v803_v3  ;;  %v180_v22 = vpop.permute.xlu0 %179 }
  0x88   :  { %v221_v24 = vmax.f32 %v873_v38, %v180_v22  ;;  %v240_v7 = vpop.permute.xlu1 %239 }
  0x8a   :  { %715 = vmatmul.mubr.msk.f32.gmra.mxu0 %vm305_vm6, %v280_v6  ;;  %v281_v8 = vmax.f32 %v221_v24, %v240_v7 }
  0x8b   :  { %717 = vmatprep.mubr.msk.f32.mxu0 %vm804_vm2, %v803_v3  ;;  %v182_v9 = vpop.permute.xlu0 %181 }
  0x8c   :  { %v222_v31 = vmax.f32 %v884_v46, %v182_v9  ;;  %v242_v11 = vpop.permute.xlu1 %241 }
  0x8e   :  { %718 = vmatmul.mubr.msk.f32.gmra.mxu0 %vm305_vm6, %v281_v8  ;;  %v282_v12 = vmax.f32 %v222_v31, %v242_v11 }
  0x8f   :  { %720 = vmatprep.mubr.msk.f32.mxu0 %vm804_vm2, %v803_v3  ;;  %v184_v13 = vpop.permute.xlu0 %183 }
  0x90   :  { %v223_v38 = vmax.f32 %v902_v56, %v184_v13  ;;  %v244_v14 = vpop.permute.xlu1 %243 }
  0x92   :  { %721 = vmatmul.mubr.msk.f32.gmra.mxu0 %vm305_vm6, %v282_v12  ;;  %v283_v15 = vmax.f32 %v223_v38, %v244_v14 }
  0x93   :  { %723 = vmatprep.mubr.msk.f32.mxu0 %vm804_vm2, %v803_v3  ;;  %v186_v16 = vpop.permute.xlu0 %185 }
  0x94   :  { %v224_v46 = vmax.f32 %v917_v1, %v186_v16  ;;  %v246_v18 = vpop.permute.xlu1 %245 }
  0x96   :  { %724 = vmatmul.mubr.msk.f32.gmra.mxu0 %vm305_vm6, %v283_v15  ;;  %v284_v19 = vmax.f32 %v224_v46, %v246_v18 }
  0x97   :  { %726 = vmatprep.mubr.msk.f32.mxu0 %vm804_vm2, %v803_v3  ;;  %v188_v20 = vpop.permute.xlu0 %187 }
  0x98   :  { %v225_v56 = vmax.f32 %v929_v10, %v188_v20  ;;  %v248_v21 = vpop.permute.xlu1 %247 }
  0x9a   :  { %727 = vmatmul.mubr.msk.f32.gmra.mxu0 %vm305_vm6, %v284_v19  ;;  %v285_v23 = vmax.f32 %v225_v56, %v248_v21  ;;  %v498_v21 = vmul.u32 3, %v886_v48 }
  0x9b   :  { %729 = vmatprep.mubr.msk.f32.mxu0 %vm804_vm2, %v803_v3  ;;  %v190_v25 = vpop.permute.xlu0 %189 }
  0x9c   :  { %v226_v1 = vmax.f32 %v940_v17, %v190_v25  ;;  %v250_v27 = vpop.permute.xlu1 %249  ;;  %vm503_vm7 = vcmp.eq.s32.totalorder %v898_v55, %v498_v21  ;;  %v495_v25 = vadd.s32 16, %v886_v48 }
  0x9e   :  { %730 = vmatmul.mubr.msk.f32.gmra.mxu0 %vm305_vm6, %v285_v23  ;;  %v286_v28 = vmax.f32 %v226_v1, %v250_v27  ;;  %v499_v23 = vmul.u32 3, %v896_v54  ;;  %v656_v1 = vsel %vm503_vm7, 1.0, %v803_v3  ;;  %v500_v27 = vmul.u32 3, %v495_v25 }
  0x9f   :  { %732 = vmatprep.mubr.msk.f32.mxu0 %vm804_vm2, %v803_v3  ;;  %v192_v29 = vpop.permute.xlu0 %191 }
  0xa0   :  { %v227_v10 = vmax.f32 %v951_v26, %v192_v29  ;;  %v252_v30 = vpop.permute.xlu1 %251  ;;  %vm504_vm9 = vcmp.eq.s32.totalorder %v898_v55, %v499_v23  ;;  %vm505_vm10 = vcmp.eq.s32.totalorder %v898_v55, %v500_v27 }
  0xa1   :  { %v657_v54 = vsel %vm504_vm9, 1.0, %v803_v3 }
  0xa2   :  { %733 = vmatmul.mubr.msk.f32.gmra.mxu0 %vm305_vm6, %v286_v28  ;;  %v287_v32 = vmax.f32 %v227_v10, %v252_v30  ;;  %v496_v28 = vadd.s32 24, %v886_v48  ;;  %v497_v10 = vadd.s32 32, %v886_v48  ;;  %v658_v30 = vsel %vm505_vm10, 1.0, %v803_v3 }
  0xa3   :  { %735 = vmatprep.mubr.msk.f32.mxu0 %vm804_vm2, %v803_v3  ;;  %v194_v33 = vpop.permute.xlu0 %193 }
  0xa4   :  { %v228_v17 = vmax.f32 %v962_v34, %v194_v33  ;;  %v254_v35 = vpop.permute.xlu1 %253  ;;  %v501_v29 = vmul.u32 3, %v496_v28 }
  0xa6   :  { %736 = vmatmul.mubr.msk.f32.gmra.mxu0 %vm305_vm6, %v287_v32  ;;  %v288_v36 = vmax.f32 %v228_v17, %v254_v35  ;;  %vm506_vm11 = vcmp.eq.s32.totalorder %v898_v55, %v501_v29  ;;  %v502_v32 = vmul.u32 3, %v497_v10 }
  0xa7   :  { %738 = vmatprep.mubr.msk.f32.mxu0 %vm804_vm2, %v803_v3  ;;  %v196_v37 = vpop.permute.xlu0 %195  ;;  %v659_v33 = vsel %vm506_vm11, 1.0, %v803_v3 }
  0xa8   :  { %v229_v26 = vmax.f32 %v970_v41, %v196_v37  ;;  %v256_v39 = vpop.permute.xlu1 %255  ;;  %vm507_vm12 = vcmp.eq.s32.totalorder %v898_v55, %v502_v32 }
  0xa9   :  { %v660_v48 = vsel %vm507_vm12, 1.0, %v803_v3 }
  0xaa   :  { %739 = vmatmul.mubr.msk.f32.gmra.mxu0 %vm305_vm6, %v288_v36  ;;  %v289_v40 = vmax.f32 %v229_v26, %v256_v39 }
  0xab   :  { %741 = vmatprep.mubr.msk.f32.mxu0 %vm804_vm2, %v803_v3  ;;  %v198_v42 = vpop.permute.xlu0 %197 }
  0xac   :  { %v230_v34 = vmax.f32 %v978_v47, %v198_v42  ;;  %v258_v43 = vpop.permute.xlu1 %257 }
  0xae   :  { %742 = vmatmul.mubr.msk.f32.gmra.mxu0 %vm305_vm6, %v289_v40  ;;  %v290_v44 = vmax.f32 %v230_v34, %v258_v43 }
  0xaf   :  { %744 = vmatprep.mubr.msk.f32.mxu0 %vm804_vm2, %v803_v3  ;;  %v200_v45 = vpop.permute.xlu0 %199 }
  0xb0   :  { %v231_v41 = vmax.f32 %v985_v51, %v200_v45  ;;  %v260_v49 = vpop.permute.xlu1 %259 }
  0xb2   :  { %745 = vmatmul.mubr.msk.f32.gmra.mxu0 %vm305_vm6, %v290_v44  ;;  %v291_v50 = vmax.f32 %v231_v41, %v260_v49 }
  0xb3   :  { %747 = vmatprep.mubr.msk.f32.mxu0 %vm804_vm2, %v803_v3  ;;  %v202_v52 = vpop.permute.xlu0 %201 }
  0xb4   :  { %v232_v47 = vmax.f32 %v991_v53, %v202_v52  ;;  %v262_v57 = vpop.permute.xlu1 %261 }
  0xb6   :  { %748 = vmatmul.mubr.msk.f32.gmra.mxu0 %vm305_vm6, %v291_v50  ;;  %v292_v58 = vmax.f32 %v232_v47, %v262_v57 }
  0xb7   :  { %750 = vmatprep.mubr.msk.f32.mxu0 %vm804_vm2, %v803_v3 }
  0xba   :  { %751 = vmatmul.mubr.msk.f32.gmra.mxu0 %vm305_vm6, %v292_v58 }
 0x142   :  { %v1057_v51 = vpop.f32.mrf.mxu0 }
 0x144   :  { %v710_v59 = vpop.f32.mrf.mxu0 }
 0x146   :  { %v426_v60 = vpop.f32.mrf.mxu0 }
 0x148   :  { %v713_v61 = vpop.f32.mrf.mxu0 }
 0x14a   :  { %v431_v62 = vpop.f32.mrf.mxu0 }
 0x14c   :  { %v716_v63 = vpop.f32.mrf.mxu0 }
 0x14e   :  { %v436_v0 = vpop.f32.mrf.mxu0 }
 0x150   :  { %v719_v2 = vpop.f32.mrf.mxu0 }
 0x152   :  { %v441_v4 = vpop.f32.mrf.mxu0 }
 0x154   :  { %v722_v53 = vpop.f32.mrf.mxu0 }
 0x156   :  { %v446_v5 = vpop.f32.mrf.mxu0 }
 0x158   :  { %v725_v6 = vpop.f32.mrf.mxu0 }
 0x15a   :  { %v451_v22 = vpop.f32.mrf.mxu0 }
 0x15c   :  { %v728_v24 = vpop.f32.mrf.mxu0 }
 0x15e   :  { %v456_v7 = vpop.f32.mrf.mxu0 }
 0x160   :  { %v731_v8 = vpop.f32.mrf.mxu0 }
 0x162   :  { %v461_v9 = vpop.f32.mrf.mxu0 }
 0x164   :  { %v734_v31 = vpop.f32.mrf.mxu0 }
 0x166   :  { %v466_v11 = vpop.f32.mrf.mxu0 }
 0x168   :  { %v737_v12 = vpop.f32.mrf.mxu0 }
 0x16a   :  { %v471_v13 = vpop.f32.mrf.mxu0 }
 0x16c   :  { %v740_v38 = vpop.f32.mrf.mxu0 }
 0x16e   :  { %v476_v14 = vpop.f32.mrf.mxu0 }
 0x170   :  { %v743_v15 = vpop.f32.mrf.mxu0 }
 0x172   :  { %v481_v16 = vpop.f32.mrf.mxu0 }
 0x174   :  { %v746_v46 = vpop.f32.mrf.mxu0 }
 0x176   :  { %v486_v18 = vpop.f32.mrf.mxu0 }
 0x178   :  { %v749_v19 = vpop.f32.mrf.mxu0 }
 0x17a   :  { %v491_v20 = vpop.f32.mrf.mxu0 }
 0x17b   :  { %754 = vmatpush3.msk.msra.mxu1 %vm98_vm1, %v491_v20 }
 0x17c   :  { %v752_v56 = vpop.f32.mrf.mxu0  ;;  %755 = vmatprep.subr.mxu1 %v803_v3 }
 0x17d   :  { %756 = vmatpush3.msra.mxu1 %v486_v18 }
 0x17e   :  { %757 = vmatprep.subr.mxu1 %v803_v3 }
 0x17f   :  { %758 = vmatpush3.msra.mxu1 %v481_v16 }
 0x180   :  { %759 = vmatprep.subr.mxu1 %v803_v3 }
 0x181   :  { %760 = vmatpush3.msra.mxu1 %v476_v14 }
 0x182   :  { %761 = vmatprep.subr.mxu1 %v803_v3 }
 0x183   :  { %762 = vmatpush3.msra.mxu1 %v471_v13 }
 0x184   :  { %763 = vmatprep.subr.mxu1 %v803_v3 }
 0x185   :  { %764 = vmatpush3.msra.mxu1 %v466_v11 }
 0x186   :  { %765 = vmatprep.subr.mxu1 %v803_v3 }
 0x187   :  { %766 = vmatpush3.msra.mxu1 %v461_v9 }
 0x188   :  { %767 = vmatprep.subr.mxu1 %v803_v3 }
 0x189   :  { %768 = vmatpush3.msra.mxu1 %v456_v7 }
 0x18a   :  { %769 = vmatprep.subr.mxu1 %v803_v3 }
 0x18b   :  { %770 = vmatpush3.msra.mxu1 %v451_v22 }
 0x18c   :  { %771 = vmatprep.subr.mxu1 %v803_v3 }
 0x18d   :  { %772 = vmatpush3.msra.mxu1 %v446_v5 }
 0x18e   :  { %773 = vmatprep.subr.mxu1 %v803_v3 }
 0x18f   :  { %774 = vmatpush3.msra.mxu1 %v441_v4 }
 0x190   :  { %775 = vmatprep.subr.mxu1 %v803_v3 }
 0x191   :  { %776 = vmatpush3.msra.mxu1 %v436_v0 }
 0x192   :  { %777 = vmatprep.subr.mxu1 %v803_v3 }
 0x193   :  { %778 = vmatpush3.msra.mxu1 %v431_v62 }
 0x194   :  { %779 = vmatprep.subr.mxu1 %v803_v3 }
 0x195   :  { %780 = vmatpush3.msra.mxu1 %v426_v60 }
 0x196   :  { %781 = vmatprep.subr.mxu1 %v803_v3 }
 0x197   :  { %782 = vmatpush3.msra.mxu1 %v1057_v51 }
 0x198   :  { %784 = vmatmul.mubr.msk.f32.vlgmr.msra.gmra.mxu1 %vm518_vm8, %v656_v1 }
 0x199   :  { %786 = vmatprep.mubr.msk.f32.mxu1 %vm804_vm2, %v803_v3 }
 0x19c   :  { %787 = vmatmul.mubr.msk.f32.gmra.mxu1 %vm518_vm8, %v657_v54 }
 0x19d   :  { %789 = vmatprep.mubr.msk.f32.mxu1 %vm804_vm2, %v803_v3 }
 0x1a0   :  { %790 = vmatmul.mubr.msk.f32.gmra.mxu1 %vm518_vm8, %v658_v30 }
 0x1a1   :  { %792 = vmatprep.mubr.msk.f32.mxu1 %vm804_vm2, %v803_v3 }
 0x1a4   :  { %793 = vmatmul.mubr.msk.f32.gmra.mxu1 %vm518_vm8, %v659_v33 }
 0x1a5   :  { %795 = vmatprep.mubr.msk.f32.mxu1 %vm804_vm2, %v803_v3 }
 0x1a8   :  { %796 = vmatmul.mubr.msk.f32.gmra.mxu1 %vm518_vm8, %v660_v48 }
 0x258   :  { %v603_v17 = vpop.f32.mrf.mxu1 }
 0x259   :  { %628 = vst.msk [vmem:[%s1119_s1] sm:$0xff] %vm627_vm13, %v603_v17 }
 0x25a   :  { %v785_v35 = vpop.f32.mrf.mxu1 }
 0x25c   :  { %v608_v36 = vpop.f32.mrf.mxu1 }
 0x25d   :  { %629 = vst.msk [vmem:[%s1119_s1 + $0x8] sm:$0xff] %vm627_vm13, %v608_v36 }
 0x25e   :  { %v788_v55 = vpop.f32.mrf.mxu1 }
 0x260   :  { %v613_v37 = vpop.f32.mrf.mxu1 }
 0x261   :  { %630 = vst.msk [vmem:[%s1119_s1 + $0x10] sm:$0xff] %vm627_vm13, %v613_v37 }
 0x262   :  { %v791_v3 = vpop.f32.mrf.mxu1 }
 0x264   :  { %v618_v26 = vpop.f32.mrf.mxu1 }
 0x265   :  { %631 = vst.msk [vmem:[%s1119_s1 + $0x18] sm:$0xff] %vm627_vm13, %v618_v26 }
 0x266   :  { %v794_v39 = vpop.f32.mrf.mxu1 }
 0x268   :  { %v623_v40 = vpop.f32.mrf.mxu1 }
 0x269   :  { %632 = vst.msk [vmem:[%s1119_s1 + $0x20] sm:$0xff] %vm627_vm13, %v623_v40 }
 0x26a   :  { %v797_v42 = vpop.f32.mrf.mxu1 }

</bundles_post_ra>
